<compile_context>
chip_gen: v7x
topology: tpu7x:2x2x1
jax: 0.10.0
libtpu: 0.0.40
codegen_flags: <defaults>
</compile_context>

<pallas_src>
import jax
import jax.numpy as jnp
from jax.experimental import pallas as pl
from jax.experimental.pallas import tpu as pltpu

_TILE_ELEMS = 512 * 1024          # ~2 MiB per block in f32, ~1 MiB in bf16
_LANE_CHOICES = (1024, 512, 256, 128)
_ROW_ALIGN = 32                   # covers 8/16/32 sublane packing (f32/bf16/int8)


def _mish_kernel(x_ref, o_ref):
    # Upcast to f32 for the math; I/O stays in the native dtype.
    x = x_ref[...].astype(jnp.float32)
    # tanh(softplus(x)) with a single exp of -|x| (EUP) + one approx reciprocal
    # (EUP vrcp) refined by a Newton step (VPU, free slots). No overflow:
    # u = exp(-|x|) is always in (0, 1].
    u = jnp.exp(-jnp.abs(x))
    u2 = u * u
    two_u = 2.0 * u
    pos = x >= 0.0
    num = jnp.where(pos, 1.0 + two_u, u2 + two_u)
    den = num + jnp.where(pos, 2.0 * u2, 2.0)
    r = pl.reciprocal(den, approx=True)
    r = r * (2.0 - den * r)          # one Newton-Raphson step -> ~f32-exact
    o_ref[...] = (x * num * r).astype(o_ref.dtype)


def _round_up(n, m):
    return ((n + m - 1) // m) * m


def _mish_2d(x2, lanes):
    """Run the tiled Pallas call on a (rows, lanes) lane-dense slab."""
    rows = x2.shape[0]
    max_rows = max(_TILE_ELEMS // lanes, _ROW_ALIGN)

    if rows <= max_rows:
        # Single block; full-extent dims are always a legal block shape.
        tile_rows = rows
    else:
        num_tiles = pl.cdiv(rows, max_rows)
        # Keep an even number of (balanced) grid steps so both v7x TCs work.
        num_tiles = _round_up(num_tiles, 2)
        tile_rows = _round_up(pl.cdiv(rows, num_tiles), _ROW_ALIGN)

    grid = (pl.cdiv(rows, tile_rows),)
    return pl.pallas_call(
        _mish_kernel,
        out_shape=jax.ShapeDtypeStruct((rows, lanes), x2.dtype),
        grid=grid,
        in_specs=[pl.BlockSpec((tile_rows, lanes), lambda i: (i, 0))],
        out_specs=pl.BlockSpec((tile_rows, lanes), lambda i: (i, 0)),
        compiler_params=pltpu.CompilerParams(
            dimension_semantics=("parallel",)),
    )(x2)


def mish(x):
    """Elementwise Mish via a tiled Pallas call. Works for any shape."""
    orig_shape = x.shape
    if not jnp.issubdtype(x.dtype, jnp.floating):
        # Mish is only defined for floating types (as in PyTorch); integer
        # inputs are computed and returned in f32.
        x = x.astype(jnp.float32)
    n = x.size
    if n == 0:
        return x

    # Fast path: widest lane-dense last dim that divides n -> free reshape,
    # no pad, no slice.
    for lanes in _LANE_CHOICES:
        if n % lanes == 0:
            rows = n // lanes
            out = _mish_2d(x.reshape(rows, lanes), lanes)
            return out.reshape(orig_shape)

    # Ragged fallback (rare): pad the flat array to a multiple of 128 lanes.
    lanes = 128
    rows = pl.cdiv(n, lanes)
    padded = rows * lanes
    xf = jnp.pad(jnp.ravel(x), (0, padded - n))
    out = _mish_2d(xf.reshape(rows, lanes), lanes)
    return out.reshape(padded)[:n].reshape(orig_shape)


def _mish_ref(x):
    xf = x.astype(jnp.float32)
    return xf * jnp.tanh(jax.nn.softplus(xf))


if __name__ == "__main__":
    key = jax.random.PRNGKey(0)

    # Main example (module-consistent small shape).
    x = jax.random.normal(key, (2, 4, 16, 16), jnp.float32) * 3.0
    y = jax.block_until_ready(mish(x))
    ref = _mish_ref(x)
    assert y.shape == x.shape, f"shape mismatch: {y.shape} vs {x.shape}"
    assert y.dtype == x.dtype
    assert jnp.allclose(y, ref, atol=1e-5, rtol=1e-4), "mish mismatch"

    # Multi-tile grid path (2M elements -> several ~2 MiB blocks).
    x_big = jax.random.normal(jax.random.PRNGKey(1), (2, 1024, 1024),
                              jnp.float32) * 3.0
    y_big = jax.block_until_ready(mish(x_big))
    assert jnp.allclose(y_big, _mish_ref(x_big), atol=1e-5, rtol=1e-4), \
        "mish (big) mismatch"

    # Native bf16 I/O path (halved HBM traffic, f32 math inside the kernel).
    x_bf16 = (jax.random.normal(jax.random.PRNGKey(2), (8, 64, 64),
                                jnp.float32) * 3.0).astype(jnp.bfloat16)
    y_bf16 = jax.block_until_ready(mish(x_bf16))
    assert y_bf16.dtype == jnp.bfloat16
    assert jnp.allclose(y_bf16.astype(jnp.float32), _mish_ref(x_bf16),
                        atol=5e-2, rtol=2e-2), "mish (bf16) mismatch"

    # Ragged element count (exercises the pad fallback path).
    x_rag = jax.random.normal(jax.random.PRNGKey(3), (3, 7, 11, 13),
                              jnp.float32) * 3.0
    y_rag = jax.block_until_ready(mish(x_rag))
    assert jnp.allclose(y_rag, _mish_ref(x_rag), atol=1e-5, rtol=1e-4), \
        "mish (ragged) mismatch"

    print("KERNEL_OK")
</pallas_src>

<mosaic_0001>
module attributes {stable_mosaic.version = 11 : i64} {
  func.func @_mish_kernel(%arg0: i32, %arg1: memref<2x1024xf32, #tpu.memory_space<vmem>>, %arg2: memref<2x1024xf32, #tpu.memory_space<vmem>>) attributes {dimension_semantics = [#tpu.dimension_semantics<parallel>], iteration_bounds = array<i64: 1>, scalar_prefetch = 0 : i64, scratch_operands = 0 : i64, tpu.core_type = #tpu.core_type<tc>, window_params = [{transform_indices = @transform_0, window_bounds = array<i64: 2, 1024>}, {transform_indices = @transform_1, window_bounds = array<i64: 2, 1024>}]} {
    %c0 = arith.constant 0 : index
    %c0_0 = arith.constant 0 : index
    %0 = vector.load %arg1[%c0, %c0_0] : memref<2x1024xf32, #tpu.memory_space<vmem>>, vector<2x1024xf32>
    %1 = math.absf %0 : vector<2x1024xf32>
    %cst = arith.constant 0.000000e+00 : f32
    %2 = vector.broadcast %cst : f32 to vector<2x1024xf32>
    %3 = arith.subf %2, %1 : vector<2x1024xf32>
    %4 = math.exp %3 : vector<2x1024xf32>
    %5 = arith.mulf %4, %4 : vector<2x1024xf32>
    %cst_1 = arith.constant 2.000000e+00 : f32
    %6 = vector.broadcast %cst_1 : f32 to vector<2x1024xf32>
    %7 = arith.mulf %6, %4 : vector<2x1024xf32>
    %cst_2 = arith.constant 0.000000e+00 : f32
    %8 = vector.broadcast %cst_2 : f32 to vector<2x1024xf32>
    %9 = arith.cmpf oge, %0, %8 : vector<2x1024xf32>
    %cst_3 = arith.constant 1.000000e+00 : f32
    %10 = vector.broadcast %cst_3 : f32 to vector<2x1024xf32>
    %11 = arith.addf %10, %7 : vector<2x1024xf32>
    %12 = arith.addf %5, %7 : vector<2x1024xf32>
    %13 = arith.select %9, %11, %12 : vector<2x1024xi1>, vector<2x1024xf32>
    %cst_4 = arith.constant 2.000000e+00 : f32
    %14 = vector.broadcast %cst_4 : f32 to vector<2x1024xf32>
    %15 = arith.mulf %14, %5 : vector<2x1024xf32>
    %cst_5 = arith.constant 2.000000e+00 : f32
    %16 = vector.broadcast %cst_5 : f32 to vector<2x1024xf32>
    %17 = arith.select %9, %15, %16 : vector<2x1024xi1>, vector<2x1024xf32>
    %18 = arith.addf %13, %17 : vector<2x1024xf32>
    %19 = tpu.reciprocal %18 {approx = true} : vector<2x1024xf32> -> vector<2x1024xf32>
    %20 = arith.mulf %18, %19 : vector<2x1024xf32>
    %cst_6 = arith.constant 2.000000e+00 : f32
    %21 = vector.broadcast %cst_6 : f32 to vector<2x1024xf32>
    %22 = arith.subf %21, %20 : vector<2x1024xf32>
    %23 = arith.mulf %19, %22 : vector<2x1024xf32>
    %24 = arith.mulf %0, %13 : vector<2x1024xf32>
    %25 = arith.mulf %24, %23 : vector<2x1024xf32>
    %c0_7 = arith.constant 0 : index
    %c0_8 = arith.constant 0 : index
    %26 = vector.load %arg2[%c0_7, %c0_8] : memref<2x1024xf32, #tpu.memory_space<vmem>>, vector<2x1024xf32>
    tpu.vector_store %arg2[%c0_7, %c0_8], %25 {strides = array<i32>} : memref<2x1024xf32, #tpu.memory_space<vmem>>, vector<2x1024xf32>,
    return
  }
  func.func @transform_0(%arg0: i32) -> (i32, i32) {
    %c0_i32 = arith.constant 0 : i32
    %c0_i32_0 = arith.constant 0 : i32
    return %arg0, %c0_i32 : i32, i32
  }
  func.func @transform_1(%arg0: i32) -> (i32, i32) {
    %c0_i32 = arith.constant 0 : i32
    %c0_i32_0 = arith.constant 0 : i32
    return %arg0, %c0_i32 : i32, i32
  }
}

</mosaic_0001>

<bundles_post_ra>
// kernel: tpu_custom_call.1
= control target key start
LH: loop header
LB: loop body
LE: loop exit
PB: predicated region body
PF: predicated region fallthrough
CT: control target
= control target key end

     0   :  { %6 = vsyncpa [#allocation3], 0  ;;  %s172_s0 = inlined_call_operand.hbm [shape: f32[2,1024], index: 0, kind: input, shape index: {}]   ;;  %s173_s1 = inlined_call_operand.hbm [shape: f32[2,1024], index: 1, kind: output, shape index: {}]  }
   0x1   :  { %7 = vsyncpa [#allocation4], 0  ;;  %s136_s6 = smov [#allocation2]   ;;  %s88_s10 = scalar_lea.hbm %s172_s0, 256 }
   0x2   :  { %s14_s7 = sshll.u32 %s136_s6, 4  ;;  %p89_p0 = scmp.ne.s32.totalorder %s172_s0, %s88_s10  ;;  %s15_s7 = int_to_ptr.vmem [resolvable:$true] %s14_s7 }
   0x3   :  { %p92_p1 = scmp.lt.u32.totalorder %s88_s10, %s172_s0 }
   0x5   :  { %p94_p2 = pnand %p92_p1, %p89_p0 }
   0x7   :  { %97 = shalt.err (!%p94_p2)
}
   0x8   :  { %s98_s15 = scalar_lea.vmem %s15_s7, 256  ;;  %p103_p4 = scmp.lt.s32.totalorder %s15_s7, %s15_s7 }
   0x9   :  { %p99_p3 = scmp.ne.s32.totalorder %s15_s7, %s98_s15  ;;  %p104_p5 = scmp.lt.s32.totalorder %s98_s15, %s98_s15 }
   0xb   :  { %p105_p6 = por %p104_p5, %p103_p4 }
   0xd   :  { %p106_p7 = pnand %p105_p6, %p99_p3 }
   0xf   :  { %109 = shalt.err (!%p106_p7)
}
  0x10   :  { %17 = dma.hbm_to_vmem [thread:$0]  %s172_s0, 256, %s15_s7, [#allocation3]  }
  0x11   :  { %132 = dma.done.wait [#allocation3], 256  }
  0x12   :  { %133 = vsyncadd [#allocation3], 4294967040  ;;  %v21_v0 = vld [vmem:[#allocation2] sm:$0xff]  ;;  %v22_v1 = vld [vmem:[#allocation2 + $0x8] sm:$0xff]  ;;  %s137_s0 = smov [#allocation5]  }
  0x13   :  { %v23_v2 = vand.u32 2147483647, %v21_v0  ;;  %v24_v3 = vand.u32 2147483647, %v22_v1  ;;  %vm35_vm0 = vcmp.ge.f32.partialorder %v21_v0, 0.0  ;;  %vm36_vm1 = vcmp.ge.f32.partialorder %v22_v1, 0.0 }
  0x14   :  { %s69_s18 = sshll.u32 %s137_s0, 4  ;;  %s70_s18 = int_to_ptr.vmem [resolvable:$true] %s69_s18 }
  0x15   :  { %v25_v4 = vsub.f32 0.0, %v23_v2  ;;  %v26_v5 = vsub.f32 0.0, %v24_v3  ;;  %s110_s19 = scalar_lea.vmem %s70_s18, 256  ;;  %p115_p9 = scmp.lt.s32.totalorder %s70_s18, %s70_s18 }
  0x16   :  { %p111_p8 = scmp.ne.s32.totalorder %s70_s18, %s110_s19  ;;  %p116_p10 = scmp.lt.s32.totalorder %s110_s19, %s110_s19 }
  0x17   :  { %v27_v6 = vmul.f32 1.442695, %v25_v4  ;;  %v29_v7 = vmul.f32 1.442695, %v26_v5 }
  0x18   :  { %p117_p11 = por %p116_p10, %p115_p9 }
  0x19   :  { %80 = vpow2.f32 %v27_v6 }
  0x1a   :  { %82 = vpow2.f32 %v29_v7  ;;  %p118_p12 = pnand %p117_p11, %p111_p8 }
  0x23   :  { %v81_v8 = vpop.eup %80 }
  0x24   :  { %v83_v9 = vpop.eup %82  ;;  %v31_v10 = vmul.f32 %v81_v8, %v81_v8  ;;  %v33_v11 = vmul.f32 2.0, %v81_v8 }
  0x25   :  { %v32_v12 = vmul.f32 %v83_v9, %v83_v9  ;;  %v34_v13 = vmul.f32 2.0, %v83_v9 }
  0x26   :  { %v37_v14 = vadd.f32 1.0, %v33_v11  ;;  %v39_v15 = vadd.f32 %v33_v11, %v31_v10  ;;  %v43_v16 = vmul.f32 2.0, %v31_v10 }
  0x27   :  { %v38_v17 = vadd.f32 1.0, %v34_v13  ;;  %v40_v18 = vadd.f32 %v34_v13, %v32_v12  ;;  %v44_v19 = vmul.f32 2.0, %v32_v12 }
  0x28   :  { %v41_v20 = vsel %vm35_vm0, %v37_v14, %v39_v15  ;;  %v45_v21 = vsel %vm35_vm0, %v43_v16, 2.0 }
  0x29   :  { %v47_v22 = vadd.f32 %v45_v21, %v41_v20  ;;  %v42_v23 = vsel %vm36_vm1, %v38_v17, %v40_v18  ;;  %v46_v24 = vsel %vm36_vm1, %v44_v19, 2.0  ;;  %v57_v31 = vmul.f32 %v41_v20, %v21_v0 }
  0x2a   :  { %v48_v25 = vadd.f32 %v46_v24, %v42_v23  ;;  %v58_v33 = vmul.f32 %v42_v23, %v22_v1 }
  0x2b   :  { %84 = vrcp.f32 %v47_v22 }
  0x2c   :  { %86 = vrcp.f32 %v48_v25 }
  0x35   :  { %v85_v26 = vpop.eup %84 }
  0x36   :  { %v87_v27 = vpop.eup %86  ;;  %v51_v28 = vmul.f32 %v85_v26, %v47_v22 }
  0x37   :  { %v52_v29 = vmul.f32 %v87_v27, %v48_v25 }
  0x38   :  { %v53_v30 = vsub.f32 2.0, %v51_v28 }
  0x39   :  { %v54_v32 = vsub.f32 2.0, %v52_v29 }
  0x3a   :  { %v55_v34 = vmul.f32 %v85_v26, %v53_v30 }
  0x3b   :  { %v56_v35 = vmul.f32 %v87_v27, %v54_v32 }
  0x3c   :  { %v59_v36 = vmul.f32 %v57_v31, %v55_v34 }
  0x3d   :  { %v60_v37 = vmul.f32 %v58_v33, %v56_v35 }
  0x3e   :  { %61 = vst [vmem:[#allocation5] sm:$0xff] %v59_v36 }
  0x3f   :  { %62 = vst [vmem:[#allocation5 + $0x8] sm:$0xff] %v60_v37 }
  0x40   :  { %121 = shalt.err (!%p118_p12)
}
  0x41   :  { %s122_s22 = scalar_lea.hbm %s173_s1, 256 }
  0x42   :  { %p123_p13 = scmp.ne.s32.totalorder %s173_s1, %s122_s22  ;;  %p126_p0 = scmp.lt.u32.totalorder %s122_s22, %s173_s1 }
  0x44   :  { %p128_p1 = pnand %p126_p0, %p123_p13 }
  0x46   :  { %131 = shalt.err (!%p128_p1)
}
  0x47   :  { %72 = dma.vmem_to_hbm [thread:$0]  %s70_s18, 256, %s173_s1, [#allocation4]  }
  0x48   :  { %134 = dma.done.wait [#allocation4], 256  }
  0x49   :  { %135 = vsyncadd [#allocation4], 4294967040 }
  0x4a   :  { %76 = vsyncpa [#allocation3], 1 }
  0x4b   :  { %77 = vsyncpa [#allocation4], 1 }

</bundles_post_ra>
